<compile_context>
chip_gen: v5e
topology: v5e:2x2
jax: 0.10.0
libtpu: 0.0.40
codegen_flags: <defaults>
</compile_context>

<pallas_src>
import jax
import jax.numpy as jnp
from jax.experimental import pallas as pl
from jax.experimental.pallas import tpu as pltpu

HIDDEN = 128          # fixed by the PyTorch module: nn.Linear(state_dim, 128)
LANE = 128            # TPU lane width; output feature dim padded to a multiple of this
SUBLANE = 8           # TPU sublane granularity for the batch tile
MAX_BATCH_TILE = 512  # rows per grid step once the batch is large


def cem_mlp_kernel(x_ref, w1_ref, b1_ref, w2_ref, b2_ref, out_ref):
    """One batch tile of: relu(x @ W1 + b1) @ W2 + b2.

    x / W1 / W2 arrive as bf16 (halves DMA bytes, full-rate MXU on v6e/v7x);
    accumulation, bias add and ReLU stay in f32 for accuracy.
    """
    h = jnp.dot(x_ref[...], w1_ref[...], preferred_element_type=jnp.float32)
    h = jnp.maximum(h + b1_ref[...], 0.0)  # f32 bias + ReLU on the VPU
    logits = jnp.dot(h.astype(jnp.bfloat16), w2_ref[...],
                     preferred_element_type=jnp.float32)
    out_ref[...] = logits + b2_ref[...]    # f32, lane-dense (A padded to 128)


def cem_forward(x, w1, b1, w2, b2):
    """Pallas forward pass of CEM.network for any batch size B."""
    B, S = x.shape
    H = w1.shape[1]
    A = w2.shape[1]

    # ---- lane-dense output: pad A -> multiple of 128 with exactly-zero cols ----
    A_pad = max(LANE, ((A + LANE - 1) // LANE) * LANE)
    w2_p = jnp.zeros((H, A_pad), jnp.float32).at[:, :A].set(w2.astype(jnp.float32))
    b2_p = jnp.zeros((1, A_pad), jnp.float32).at[0, :A].set(b2.astype(jnp.float32))
    b1_p = b1.reshape(1, H).astype(jnp.float32)

    # ---- batch tiling: pad B to a sublane multiple, tile up to 512 rows --------
    if B <= MAX_BATCH_TILE:
        tb = ((B + SUBLANE - 1) // SUBLANE) * SUBLANE
    else:
        tb = MAX_BATCH_TILE
    B_pad = ((B + tb - 1) // tb) * tb
    x_p = x if B_pad == B else jnp.pad(x, ((0, B_pad - B), (0, 0)))
    num_tiles = B_pad // tb

    # bf16 matmul inputs; f32 accumulation happens inside the kernel.
    x_bf = x_p.astype(jnp.bfloat16)
    w1_bf = w1.astype(jnp.bfloat16)
    w2_bf = w2_p.astype(jnp.bfloat16)

    flops = 2 * B_pad * (S * H + H * A_pad)
    bytes_accessed = (x_bf.size * 2 + w1_bf.size * 2 + w2_bf.size * 2
                      + b1_p.size * 4 + b2_p.size * 4 + B_pad * A_pad * 4)

    # TODO(synk): if this forward runs many times in the CEM loop, pin the
    # (tiny, ~16.5 KiB) weights across calls with a cross-call prefetch /
    # input_output_aliases pattern instead of re-feeding them each call.
    out = pl.pallas_call(
        cem_mlp_kernel,
        out_shape=jax.ShapeDtypeStruct((B_pad, A_pad), jnp.float32),
        grid=(num_tiles,),
        in_specs=[
            pl.BlockSpec((tb, S), lambda i: (i, 0)),       # x: tiled over batch
            pl.BlockSpec((S, H), lambda i: (0, 0)),        # W1: resident in VMEM
            pl.BlockSpec((1, H), lambda i: (0, 0)),        # b1: resident
            pl.BlockSpec((H, A_pad), lambda i: (0, 0)),    # W2: resident
            pl.BlockSpec((1, A_pad), lambda i: (0, 0)),    # b2: resident
        ],
        out_specs=pl.BlockSpec((tb, A_pad), lambda i: (i, 0)),
        compiler_params=pltpu.CompilerParams(
            dimension_semantics=("parallel",),             # shard batch tiles across TCs
        ),
        cost_estimate=pl.CostEstimate(
            flops=flops, transcendentals=0, bytes_accessed=bytes_accessed),
    )(x_bf, w1_bf, b1_p, w2_bf, b2_p)

    return out[:B, :A]


if __name__ == "__main__":
    # CEM(state_dim=32, action_n=4); H=128 is fixed by the module.
    state_dim, action_n, hidden = 32, 4, HIDDEN

    key = jax.random.PRNGKey(0)
    kx, k1, k2, k3, k4, kx2 = jax.random.split(key, 6)

    # Deterministic parameter init (PyTorch-Linear-like uniform bounds).
    bound1 = 1.0 / jnp.sqrt(state_dim)
    bound2 = 1.0 / jnp.sqrt(hidden)
    w1 = jax.random.uniform(k1, (state_dim, hidden), jnp.float32, -bound1, bound1)
    b1 = jax.random.uniform(k2, (hidden,), jnp.float32, -bound1, bound1)
    w2 = jax.random.uniform(k3, (hidden, action_n), jnp.float32, -bound2, bound2)
    b2 = jax.random.uniform(k4, (action_n,), jnp.float32, -bound2, bound2)

    def ref_fwd(xx):
        return jnp.maximum(xx @ w1 + b1, 0.0) @ w2 + b2

    # Small batch (single grid step).
    x = jax.random.normal(kx, (8, state_dim), jnp.float32)
    logits = jax.block_until_ready(cem_forward(x, w1, b1, w2, b2))
    assert logits.shape == (8, action_n)
    assert jnp.allclose(logits, ref_fwd(x), atol=2e-2, rtol=2e-2)

    # Odd batch (exercises the batch-padding path; still correct after slicing).
    x2 = jax.random.normal(kx2, (37, state_dim), jnp.float32)
    logits2 = jax.block_until_ready(cem_forward(x2, w1, b1, w2, b2))
    assert logits2.shape == (37, action_n)
    assert jnp.allclose(logits2, ref_fwd(x2), atol=2e-2, rtol=2e-2)

    # TODO(synk): get_action's np.random.choice sampling and fit()'s Adam/CE-loss
    # training step are host-side / optimizer logic, not part of forward; omitted.
    print("KERNEL_OK")
</pallas_src>

<mosaic_0001>
module attributes {stable_mosaic.version = 11 : i64} {
  func.func @cem_mlp_kernel(%arg0: i32, %arg1: memref<8x32xbf16, #tpu.memory_space<vmem>>, %arg2: memref<32x128xbf16, #tpu.memory_space<vmem>>, %arg3: memref<1x128xf32, #tpu.memory_space<vmem>>, %arg4: memref<128x128xbf16, #tpu.memory_space<vmem>>, %arg5: memref<1x128xf32, #tpu.memory_space<vmem>>, %arg6: memref<8x128xf32, #tpu.memory_space<vmem>>) attributes {dimension_semantics = [#tpu.dimension_semantics<parallel>], iteration_bounds = array<i64: 1>, scalar_prefetch = 0 : i64, scratch_operands = 0 : i64, tpu.core_type = #tpu.core_type<tc>, window_params = [{transform_indices = @transform_0, window_bounds = array<i64: 8, 32>}, {pipeline_mode = #tpu.pipeline_mode<synchronous>, transform_indices = @transform_1, window_bounds = array<i64: 32, 128>}, {pipeline_mode = #tpu.pipeline_mode<synchronous>, transform_indices = @transform_2, window_bounds = array<i64: 1, 128>}, {pipeline_mode = #tpu.pipeline_mode<synchronous>, transform_indices = @transform_3, window_bounds = array<i64: 128, 128>}, {pipeline_mode = #tpu.pipeline_mode<synchronous>, transform_indices = @transform_4, window_bounds = array<i64: 1, 128>}, {transform_indices = @transform_5, window_bounds = array<i64: 8, 128>}]} {
    %c0 = arith.constant 0 : index
    %c0_0 = arith.constant 0 : index
    %0 = vector.load %arg1[%c0, %c0_0] : memref<8x32xbf16, #tpu.memory_space<vmem>>, vector<8x32xbf16>
    %c0_1 = arith.constant 0 : index
    %c0_2 = arith.constant 0 : index
    %1 = vector.load %arg2[%c0_1, %c0_2] : memref<32x128xbf16, #tpu.memory_space<vmem>>, vector<32x128xbf16>
    %cst = arith.constant dense<0.000000e+00> : vector<8x128xf32>
    %2 = tpu.matmul %0, %1, %cst {dimension_numbers = #tpu.dot_dimension_numbers<[1], [0], [0], [1], [0, 0, 1, 1], [], []>} : vector<8x32xbf16>, vector<32x128xbf16>, vector<8x128xf32> -> vector<8x128xf32>
    %c0_3 = arith.constant 0 : index
    %c0_4 = arith.constant 0 : index
    %3 = vector.load %arg3[%c0_3, %c0_4] : memref<1x128xf32, #tpu.memory_space<vmem>>, vector<1x128xf32>
    %4 = vector.broadcast %3 : vector<1x128xf32> to vector<8x128xf32>
    %5 = arith.addf %2, %4 : vector<8x128xf32>
    %cst_5 = arith.constant 0.000000e+00 : f32
    %6 = vector.broadcast %cst_5 : f32 to vector<8x128xf32>
    %7 = arith.maximumf %5, %6 : vector<8x128xf32>
    %8 = arith.truncf %7 : vector<8x128xf32> to vector<8x128xbf16>
    %c0_6 = arith.constant 0 : index
    %c0_7 = arith.constant 0 : index
    %9 = vector.load %arg4[%c0_6, %c0_7] : memref<128x128xbf16, #tpu.memory_space<vmem>>, vector<128x128xbf16>
    %cst_8 = arith.constant dense<0.000000e+00> : vector<8x128xf32>
    %10 = tpu.matmul %8, %9, %cst_8 {dimension_numbers = #tpu.dot_dimension_numbers<[1], [0], [0], [1], [0, 0, 1, 1], [], []>} : vector<8x128xbf16>, vector<128x128xbf16>, vector<8x128xf32> -> vector<8x128xf32>
    %c0_9 = arith.constant 0 : index
    %c0_10 = arith.constant 0 : index
    %11 = vector.load %arg5[%c0_9, %c0_10] : memref<1x128xf32, #tpu.memory_space<vmem>>, vector<1x128xf32>
    %12 = vector.broadcast %11 : vector<1x128xf32> to vector<8x128xf32>
    %13 = arith.addf %10, %12 : vector<8x128xf32>
    %c0_11 = arith.constant 0 : index
    %c0_12 = arith.constant 0 : index
    %14 = vector.load %arg6[%c0_11, %c0_12] : memref<8x128xf32, #tpu.memory_space<vmem>>, vector<8x128xf32>
    tpu.vector_store %arg6[%c0_11, %c0_12], %13 {strides = array<i32>} : memref<8x128xf32, #tpu.memory_space<vmem>>, vector<8x128xf32>,
    return
  }
  func.func @transform_0(%arg0: i32) -> (i32, i32) {
    %c0_i32 = arith.constant 0 : i32
    %c0_i32_0 = arith.constant 0 : i32
    return %arg0, %c0_i32 : i32, i32
  }
  func.func @transform_1(%arg0: i32) -> (i32, i32) {
    %c0_i32 = arith.constant 0 : i32
    %c0_i32_0 = arith.constant 0 : i32
    %c0_i32_1 = arith.constant 0 : i32
    return %c0_i32, %c0_i32_0 : i32, i32
  }
  func.func @transform_2(%arg0: i32) -> (i32, i32) {
    %c0_i32 = arith.constant 0 : i32
    %c0_i32_0 = arith.constant 0 : i32
    %c0_i32_1 = arith.constant 0 : i32
    return %c0_i32, %c0_i32_0 : i32, i32
  }
  func.func @transform_3(%arg0: i32) -> (i32, i32) {
    %c0_i32 = arith.constant 0 : i32
    %c0_i32_0 = arith.constant 0 : i32
    %c0_i32_1 = arith.constant 0 : i32
    return %c0_i32, %c0_i32_0 : i32, i32
  }
  func.func @transform_4(%arg0: i32) -> (i32, i32) {
    %c0_i32 = arith.constant 0 : i32
    %c0_i32_0 = arith.constant 0 : i32
    %c0_i32_1 = arith.constant 0 : i32
    return %c0_i32, %c0_i32_0 : i32, i32
  }
  func.func @transform_5(%arg0: i32) -> (i32, i32) {
    %c0_i32 = arith.constant 0 : i32
    %c0_i32_0 = arith.constant 0 : i32
    return %arg0, %c0_i32 : i32, i32
  }
}

</mosaic_0001>

<bundles_post_ra>
// kernel: tpu_custom_call.1
= control target key start
LH: loop header
LB: loop body
LE: loop exit
PB: predicated region body
PF: predicated region fallthrough
CT: control target
= control target key end

     0   :  { %10 = vsyncpa [#allocation3], 0  ;;  %s422_s0 = inlined_call_operand.hbm [shape: bf16[8,32], index: 0, kind: input, shape index: {}]   ;;  %s423_s1 = inlined_call_operand.hbm [shape: bf16[32,128], index: 1, kind: input, shape index: {}]   ;;  %s424_s2 = inlined_call_operand.vmem [shape: f32[1,128], index: 2, kind: input, shape index: {}]   ;;  %s425_s3 = inlined_call_operand.hbm [shape: bf16[128,128], index: 3, kind: input, shape index: {}]   ;;  %s426_s4 = inlined_call_operand.vmem [shape: f32[1,128], index: 4, kind: input, shape index: {}]   ;;  %s427_s5 = inlined_call_operand.hbm [shape: f32[8,128], index: 5, kind: output, shape index: {}]  }
   0x1   :  { %11 = vsyncpa [#allocation6], 0  ;;  %s28_s20 = sshll.u32 %s423_s1, 4  ;;  %s29_s20 = int_to_ptr.hbm [resolvable:$true] %s28_s20 }
   0x2   :  { %12 = vsyncpa [#allocation4], 0  ;;  %s368_s21 = smov [#allocation5]   ;;  %s18_s25 = sshll.u32 %s422_s0, 4  ;;  %s19_s25 = int_to_ptr.hbm [resolvable:$true] %s18_s25 }
   0x3   :  { %s30_s22 = sshll.u32 %s368_s21, 4  ;;  %s369_s26 = smov 64   ;;  %s31_s22 = int_to_ptr.vmem [resolvable:$true] %s30_s22 }
   0x4   :  { %s370_s27 = smov 4   ;;  %s371_s28 = smov [#allocation2]  }
   0x5   :  { %36 = dma.hbm_to_vmem [thread:$0]  %s29_s20, 256, %s31_s22, [#allocation6], %s369_s26, %s369_s26, %s370_s27  }
   0x6   :  { %s20_s29 = sshll.u32 %s371_s28, 4  ;;  %s43_s7 = sshll.u32 %s425_s3, 4  ;;  %s21_s29 = int_to_ptr.vmem [resolvable:$true] %s20_s29  ;;  %s44_s7 = int_to_ptr.hbm [resolvable:$true] %s43_s7 }
   0x7   :  { %23 = dma.hbm_to_vmem [thread:$0]  %s19_s25, 64, %s21_s29, [#allocation3]  }
   0x8   :  { %s372_s1 = smov [#allocation7]  }
   0x9   :  { %s45_s8 = sshll.u32 %s372_s1, 4  ;;  %s46_s8 = int_to_ptr.vmem [resolvable:$true] %s45_s8 }
   0xa   :  { %51 = dma.hbm_to_vmem [thread:$0]  %s44_s7, 1024, %s46_s8, [#allocation6], %s369_s26, %s369_s26, %s370_s27  }
   0xb   :  { %362 = dma.done.wait [#allocation3], 64  }
   0xc   :  { %363 = vsyncadd [#allocation3], 4294967232 }
   0xd   :  { %364 = dma.done.wait [#allocation6], 1280  }
   0xe   :  { %365 = vsyncadd [#allocation6], 4294966016  ;;  %v249_v0 = vld [vmem:[#allocation5 + $0x8] sm:$0xff]  ;;  %v248_v2 = vld [vmem:[#allocation5] sm:$0xff]  ;;  %vm88_vm0 = vcmask 261120   ;;  %s373_s11 = smov [#allocation8]  }
   0xf   :  { %v257_v1 = vld [vmem:[#allocation7 + $0x38] sm:$0xff]  ;;  %98 = vmatpush.bf16.msra.mxu0 %v249_v0  ;;  %v256_v3 = vld [vmem:[#allocation7 + $0x30] sm:$0xff]  ;;  %v67_v4 = vld [vmem:[#allocation2] sm:$0xf]  ;;  %s194_s12 = sshll.u32 %s373_s11, 4  ;;  %s196_s15 = sshll.u32 %s427_s5, 4  ;;  %s195_s12 = int_to_ptr.vmem [resolvable:$true] %s194_s12  ;;  %s197_s15 = int_to_ptr.hbm [resolvable:$true] %s196_s15 }
  0x10   :  { %175 = vmatpush.bf16.msra.mxu1 %v257_v1  ;;  %v255_v5 = vld [vmem:[#allocation7 + $0x28] sm:$0xff]  ;;  %v254_v6 = vld [vmem:[#allocation7 + $0x20] sm:$0xff]  ;;  %v253_v7 = vld [vmem:[#allocation7 + $0x18] sm:$0xff] }
  0x11   :  { %v252_v8 = vld [vmem:[#allocation7 + $0x10] sm:$0xff]  ;;  %v251_v9 = vld [vmem:[#allocation7 + $0x8] sm:$0xff]  ;;  %v250_v10 = vld [vmem:[#allocation7] sm:$0xff] }
  0x12   :  { %v264_v11 = vld [vmem:[%s424_s2] ss:$0 sm:$0xff] }
  0x13   :  { %99 = vmatpush.bf16.msra.mxu0 %v248_v2  ;;  %v265_v17 = vld [vmem:[%s426_s4] ss:$0 sm:$0xff] }
  0x14   :  { %176 = vmatpush.bf16.msra.mxu1 %v256_v3 }
  0x16   :  { %215 = vmatmul.msk.bf16.vlgmr.msra.gmra.mxu0 %vm88_vm0, %v67_v4 }
  0x18   :  { %177 = vmatpush.bf16.msra.mxu1 %v255_v5 }
  0x1c   :  { %178 = vmatpush.bf16.msra.mxu1 %v254_v6 }
  0x20   :  { %179 = vmatpush.bf16.msra.mxu1 %v253_v7 }
  0x24   :  { %180 = vmatpush.bf16.msra.mxu1 %v252_v8 }
  0x28   :  { %181 = vmatpush.bf16.msra.mxu1 %v251_v9 }
  0x2c   :  { %182 = vmatpush.bf16.msra.mxu1 %v250_v10 }
  0x93   :  { %v101_v12 = vpop.f32.mrf.mxu0 }
  0x94   :  { %v102_v13 = vadd.f32 %v264_v11, %v101_v12 }
  0x96   :  { %v105_v14 = vmax.f32 %v102_v13, 0.0 }
  0x98   :  { %v106_v15 = vpack.c.bf16 %v105_v14, %v105_v14 }
  0x9a   :  { %183 = vmatmul.bf16.vlgmr.msra.gmra.mxu1 %v106_v15 }
  0x9b   :  { %v103_v16 = vpop.f32.mrf.mxu0 }
 0x117   :  { %v184_v18 = vpop.f32.mrf.mxu1 }
 0x118   :  { %v185_v19 = vadd.f32 %v265_v17, %v184_v18 }
 0x11a   :  { %188 = vst [vmem:[#allocation8] sm:$0xff] %v185_v19 }
 0x11b   :  { %199 = dma.vmem_to_hbm [thread:$0]  %s195_s12, 128, %s197_s15, [#allocation4]  }
 0x11f   :  { %v186_v20 = vpop.f32.mrf.mxu1 }
 0x120   :  { %366 = dma.done.wait [#allocation4], 128  }
 0x121   :  { %367 = vsyncadd [#allocation4], 4294967168 }
 0x122   :  { %204 = vsyncpa [#allocation3], 1 }
 0x123   :  { %205 = vsyncpa [#allocation6], 1 }
 0x124   :  { %206 = vsyncpa [#allocation4], 1 }

</bundles_post_ra>
